<compile_context>
chip_gen: v7x
topology: tpu7x:2x2x1
jax: 0.10.0
libtpu: 0.0.40
codegen_flags: <defaults>
</compile_context>

<pallas_src>
import functools

import jax
import jax.numpy as jnp
from jax.experimental import pallas as pl
from jax.experimental.pallas import tpu as pltpu

HIDDEN = 100          # true hidden width from the module
LANE = 128            # TPU lane width / padded hidden dim
MAX_BLOCK_B = 1024    # batch-tile cap (multiple of 8); tiny VMEM footprint


def _leaky_relu(x, slope=0.2):
    # slope < 1  =>  max(x, slope*x) == leaky_relu(x); cheaper than cmp+select.
    return jnp.maximum(x, slope * x)


def _round_up(n, m):
    return ((n + m - 1) // m) * m


def _pad_to(arr, shape):
    pads = [(0, t - s) for s, t in zip(arr.shape, shape)]
    return jnp.pad(arr, pads)


def discriminator_kernel(x_ref, w1_ref, b1_ref, w2_ref, b2_ref, w3_ref, b3_ref,
                         o_ref):
    """Full MLP forward for one batch tile, all resident in VMEM.

    o_ref is (1, 1, block_b): the result is emitted lane-dense (one row of
    block_b probabilities) instead of a 1-lane-wide column.
    """
    inp = x_ref.shape[1]                      # static block shape
    x = x_ref[...]                            # (block_b, inp) f32 -- tiny lane width

    # Layer 1: Linear(inp, 100) + LeakyReLU(0.2).
    # K = inp is tiny (2 for the 2d-line GAN) -> VPU broadcast-FMAs instead of
    # wasting an MXU push on a K=2 contraction.
    h1 = b1_ref[...]                          # (1, LANE) f32
    for k in range(inp):                      # static unrolled loop
        h1 = h1 + x[:, k:k + 1] * w1_ref[k:k + 1, :]   # (block_b,1)*(1,LANE)
    h1 = _leaky_relu(h1)                      # f32 (v5e-safe VPU path)

    # Layer 2: Linear(100, 100) + LeakyReLU(0.2).
    # bf16 operands, f32 accumulation -> full-rate MXU on all generations.
    h2 = jnp.dot(h1.astype(jnp.bfloat16), w2_ref[...],
                 preferred_element_type=jnp.float32) + b2_ref[...]
    h2 = _leaky_relu(h2)                      # (block_b, LANE) f32

    # Layer 3: Linear(100, 1) + Sigmoid, computed DIRECTLY in the lane-dense
    # (1, block_b) layout via an A @ B^T contraction (same NT dimension
    # numbers as flash-attention's q @ k^T), so no narrow column is ever
    # materialized or stored.
    h3 = jax.lax.dot_general(
        w3_ref[...], h2,                       # (1, LANE) x (block_b, LANE)^T
        dimension_numbers=(((1,), (1,)), ((), ())),
        preferred_element_type=jnp.float32) + b3_ref[...]   # (1, block_b)

    # Numerically-stable sigmoid: exp argument is always <= 0 (no overflow).
    e = jnp.exp(-jnp.abs(h3))                                  # EUP
    sig = jnp.where(h3 >= 0, 1.0, e) * pl.reciprocal(1.0 + e, approx=True)
    o_ref[0] = sig.astype(o_ref.dtype)        # (1, block_b) lane-dense store


def prepare_params(params):
    """One-time packing: pad hidden dims to 128 lanes, cast the big weight to
    bf16, transpose W3 into a row vector. Done OUTSIDE the jit'd forward."""
    w1, b1, w2, b2, w3, b3 = params
    inp = w1.shape[0]
    w1p = _pad_to(w1.astype(jnp.float32), (inp, LANE))           # (inp, 128) f32
    b1p = _pad_to(b1.reshape(1, -1).astype(jnp.float32), (1, LANE))
    w2p = _pad_to(w2.astype(jnp.float32), (LANE, LANE)).astype(jnp.bfloat16)
    b2p = _pad_to(b2.reshape(1, -1).astype(jnp.float32), (1, LANE))
    w3p = _pad_to(w3.reshape(HIDDEN, 1).T.astype(jnp.float32), (1, LANE))
    b3p = b3.reshape(1, 1).astype(jnp.float32)
    return (w1p, b1p, w2p, b2p, w3p, b3p)


@functools.partial(jax.jit, static_argnames=("block_b",))
def discriminator_forward(x, prepared, block_b=None):
    """x: (B, inp) float32 -> (B, 1) float32 (sigmoid probabilities)."""
    w1p, b1p, w2p, b2p, w3p, b3p = prepared
    B, inp = x.shape

    # Batch-tile selection (all static at trace time):
    #   B <= 256          : one tile (splitting would only add step overhead)
    #   256 < B <= 2*cap  : exactly two tiles -> both v7x TensorCores get work
    #   B > 2*cap         : cap at MAX_BLOCK_B rows per step
    if block_b is None:
        if B <= 256:
            block_b = _round_up(B, 8)
        elif B <= 2 * MAX_BLOCK_B:
            block_b = _round_up(pl.cdiv(B, 2), 8)
        else:
            block_b = MAX_BLOCK_B
    block_b = _round_up(block_b, 8)

    B_pad = _round_up(B, block_b)
    xp = x if B_pad == B else jnp.pad(x, ((0, B_pad - B), (0, 0)))

    num_tiles = B_pad // block_b
    grid = (num_tiles,)

    out = pl.pallas_call(
        discriminator_kernel,
        # Lane-dense output: one (1, block_b) row per tile.
        out_shape=jax.ShapeDtypeStruct((num_tiles, 1, block_b), jnp.float32),
        grid_spec=pltpu.PrefetchScalarGridSpec(
            num_scalar_prefetch=0,
            grid=grid,
            in_specs=[
                pl.BlockSpec((block_b, inp), lambda i: (i, 0)),   # x tile (unpadded feats)
                pl.BlockSpec((inp, LANE), lambda i: (0, 0)),      # W1 (inp, 128) f32
                pl.BlockSpec((1, LANE), lambda i: (0, 0)),        # b1
                pl.BlockSpec((LANE, LANE), lambda i: (0, 0)),     # W2 (128, 128) bf16
                pl.BlockSpec((1, LANE), lambda i: (0, 0)),        # b2
                pl.BlockSpec((1, LANE), lambda i: (0, 0)),        # W3 row (1, 128) f32
                pl.BlockSpec((1, 1), lambda i: (0, 0)),           # b3
            ],
            out_specs=pl.BlockSpec((1, 1, block_b), lambda i: (i, 0, 0)),
        ),
        compiler_params=pltpu.CompilerParams(
            dimension_semantics=("parallel",)),
    )(xp, w1p, b1p, w2p, b2p, w3p, b3p)

    # (num_tiles, 1, block_b) -> (B, 1); tiles are contiguous batch chunks.
    return out.reshape(-1)[:B].reshape(B, 1)


def init_params(key, inp):
    """Deterministic init matching PyTorch nn.Linear default U(-1/sqrt(fan_in), +)."""
    ks = jax.random.split(key, 6)

    def linear(kw, kb, fan_in, fan_out):
        bound = 1.0 / jnp.sqrt(jnp.float32(fan_in))
        w = jax.random.uniform(kw, (fan_in, fan_out), jnp.float32, -bound, bound)
        b = jax.random.uniform(kb, (fan_out,), jnp.float32, -bound, bound)
        return w, b

    w1, b1 = linear(ks[0], ks[1], inp, HIDDEN)
    w2, b2 = linear(ks[2], ks[3], HIDDEN, HIDDEN)
    w3, b3 = linear(ks[4], ks[5], HIDDEN, 1)
    return (w1, b1, w2, b2, w3, b3)


def reference_forward(x, params):
    """Pure f32 JAX reference of the PyTorch module."""
    w1, b1, w2, b2, w3, b3 = params
    h = jnp.where(x @ w1 + b1 > 0, x @ w1 + b1, 0.2 * (x @ w1 + b1))
    h = jnp.where(h @ w2 + b2 > 0, h @ w2 + b2, 0.2 * (h @ w2 + b2))
    return jax.nn.sigmoid(h @ w3 + b3)


if __name__ == "__main__":
    key = jax.random.PRNGKey(0)
    k_x, k_x2, k_p = jax.random.split(key, 3)

    INP = 2  # 2-D points, as in the 2d-line GAN
    params = init_params(k_p, INP)
    prepared = prepare_params(params)          # one-time pack (outside hot path)

    # Single-tile path.
    B = 256
    x = jax.random.normal(k_x, (B, INP), jnp.float32)
    out = jax.block_until_ready(discriminator_forward(x, prepared))
    ref = reference_forward(x, params)
    assert out.shape == (B, 1), out.shape
    # Layer-2 runs in bf16 (f32 accumulation) + approx reciprocal; tolerance sized accordingly.
    assert jnp.allclose(out, ref, atol=2e-2, rtol=2e-2), float(jnp.max(jnp.abs(out - ref)))

    # Two-tile path (exercises batch padding + multi-tile lane-dense output).
    B2 = 600
    x2 = jax.random.normal(k_x2, (B2, INP), jnp.float32)
    out2 = jax.block_until_ready(discriminator_forward(x2, prepared))
    ref2 = reference_forward(x2, params)
    assert out2.shape == (B2, 1), out2.shape
    assert jnp.allclose(out2, ref2, atol=2e-2, rtol=2e-2), float(jnp.max(jnp.abs(out2 - ref2)))

    print("KERNEL_OK")
</pallas_src>

<mosaic_0001>
module attributes {stable_mosaic.version = 11 : i64} {
  func.func @discriminator_kernel(%arg0: i32, %arg1: memref<256x2xf32, #tpu.memory_space<vmem>>, %arg2: memref<2x128xf32, #tpu.memory_space<vmem>>, %arg3: memref<1x128xf32, #tpu.memory_space<vmem>>, %arg4: memref<128x128xbf16, #tpu.memory_space<vmem>>, %arg5: memref<1x128xf32, #tpu.memory_space<vmem>>, %arg6: memref<1x128xf32, #tpu.memory_space<vmem>>, %arg7: memref<1x1xf32, #tpu.memory_space<vmem>>, %arg8: memref<1x1x256xf32, #tpu.memory_space<vmem>>) attributes {dimension_semantics = [#tpu.dimension_semantics<parallel>], iteration_bounds = array<i64: 1>, scalar_prefetch = 0 : i64, scratch_operands = 0 : i64, tpu.core_type = #tpu.core_type<tc>, window_params = [{transform_indices = @transform_0, window_bounds = array<i64: 256, 2>}, {pipeline_mode = #tpu.pipeline_mode<synchronous>, transform_indices = @transform_1, window_bounds = array<i64: 2, 128>}, {pipeline_mode = #tpu.pipeline_mode<synchronous>, transform_indices = @transform_2, window_bounds = array<i64: 1, 128>}, {pipeline_mode = #tpu.pipeline_mode<synchronous>, transform_indices = @transform_3, window_bounds = array<i64: 128, 128>}, {pipeline_mode = #tpu.pipeline_mode<synchronous>, transform_indices = @transform_4, window_bounds = array<i64: 1, 128>}, {pipeline_mode = #tpu.pipeline_mode<synchronous>, transform_indices = @transform_5, window_bounds = array<i64: 1, 128>}, {pipeline_mode = #tpu.pipeline_mode<synchronous>, transform_indices = @transform_6, window_bounds = array<i64: 1, 1>}, {transform_indices = @transform_7, window_bounds = array<i64: 1, 1, 256>}]} {
    %c0 = arith.constant 0 : index
    %c0_0 = arith.constant 0 : index
    %0 = vector.load %arg1[%c0, %c0_0] : memref<256x2xf32, #tpu.memory_space<vmem>>, vector<256x2xf32>
    %c0_1 = arith.constant 0 : index
    %c0_2 = arith.constant 0 : index
    %1 = vector.load %arg3[%c0_1, %c0_2] : memref<1x128xf32, #tpu.memory_space<vmem>>, vector<1x128xf32>
    %2 = vector.extract_strided_slice %0 {offsets = [0, 0], sizes = [256, 1], strides = [1, 1]} : vector<256x2xf32> to vector<256x1xf32>
    %c0_3 = arith.constant 0 : index
    %c0_4 = arith.constant 0 : index
    %3 = vector.load %arg2[%c0_3, %c0_4] : memref<2x128xf32, #tpu.memory_space<vmem>>, vector<1x128xf32>
    %4 = vector.broadcast %2 : vector<256x1xf32> to vector<256x128xf32>
    %5 = vector.broadcast %3 : vector<1x128xf32> to vector<256x128xf32>
    %6 = arith.mulf %4, %5 : vector<256x128xf32>
    %7 = vector.broadcast %1 : vector<1x128xf32> to vector<256x128xf32>
    %8 = arith.addf %7, %6 : vector<256x128xf32>
    %9 = vector.extract_strided_slice %0 {offsets = [0, 1], sizes = [256, 1], strides = [1, 1]} : vector<256x2xf32> to vector<256x1xf32>
    %c1 = arith.constant 1 : index
    %c0_5 = arith.constant 0 : index
    %10 = vector.load %arg2[%c1, %c0_5] : memref<2x128xf32, #tpu.memory_space<vmem>>, vector<1x128xf32>
    %11 = vector.broadcast %9 : vector<256x1xf32> to vector<256x128xf32>
    %12 = vector.broadcast %10 : vector<1x128xf32> to vector<256x128xf32>
    %13 = arith.mulf %11, %12 : vector<256x128xf32>
    %14 = arith.addf %8, %13 : vector<256x128xf32>
    %cst = arith.constant 2.000000e-01 : f32
    %15 = vector.broadcast %cst : f32 to vector<256x128xf32>
    %16 = arith.mulf %15, %14 : vector<256x128xf32>
    %17 = arith.maximumf %14, %16 : vector<256x128xf32>
    %18 = arith.truncf %17 : vector<256x128xf32> to vector<256x128xbf16>
    %c0_6 = arith.constant 0 : index
    %c0_7 = arith.constant 0 : index
    %19 = vector.load %arg4[%c0_6, %c0_7] : memref<128x128xbf16, #tpu.memory_space<vmem>>, vector<128x128xbf16>
    %cst_8 = arith.constant dense<0.000000e+00> : vector<256x128xf32>
    %20 = tpu.matmul %18, %19, %cst_8 {dimension_numbers = #tpu.dot_dimension_numbers<[1], [0], [0], [1], [0, 0, 1, 1], [], []>} : vector<256x128xbf16>, vector<128x128xbf16>, vector<256x128xf32> -> vector<256x128xf32>
    %c0_9 = arith.constant 0 : index
    %c0_10 = arith.constant 0 : index
    %21 = vector.load %arg5[%c0_9, %c0_10] : memref<1x128xf32, #tpu.memory_space<vmem>>, vector<1x128xf32>
    %22 = vector.broadcast %21 : vector<1x128xf32> to vector<256x128xf32>
    %23 = arith.addf %20, %22 : vector<256x128xf32>
    %cst_11 = arith.constant 2.000000e-01 : f32
    %24 = vector.broadcast %cst_11 : f32 to vector<256x128xf32>
    %25 = arith.mulf %24, %23 : vector<256x128xf32>
    %26 = arith.maximumf %23, %25 : vector<256x128xf32>
    %c0_12 = arith.constant 0 : index
    %c0_13 = arith.constant 0 : index
    %27 = vector.load %arg6[%c0_12, %c0_13] : memref<1x128xf32, #tpu.memory_space<vmem>>, vector<1x128xf32>
    %cst_14 = arith.constant dense<0.000000e+00> : vector<1x256xf32>
    %28 = tpu.matmul %27, %26, %cst_14 {dimension_numbers = #tpu.dot_dimension_numbers<[1], [1], [0], [0], [0, 0, 1, 0], [], []>} : vector<1x128xf32>, vector<256x128xf32>, vector<1x256xf32> -> vector<1x256xf32>
    %c0_15 = arith.constant 0 : index
    %c0_16 = arith.constant 0 : index
    %29 = vector.load %arg7[%c0_15, %c0_16] : memref<1x1xf32, #tpu.memory_space<vmem>>, vector<1x1xf32>
    %30 = vector.broadcast %29 : vector<1x1xf32> to vector<1x256xf32>
    %31 = arith.addf %28, %30 : vector<1x256xf32>
    %32 = math.absf %31 : vector<1x256xf32>
    %cst_17 = arith.constant 0.000000e+00 : f32
    %33 = vector.broadcast %cst_17 : f32 to vector<1x256xf32>
    %34 = arith.subf %33, %32 : vector<1x256xf32>
    %35 = math.exp %34 : vector<1x256xf32>
    %cst_18 = arith.constant 0.000000e+00 : f32
    %36 = vector.broadcast %cst_18 : f32 to vector<1x256xf32>
    %37 = arith.cmpf oge, %31, %36 : vector<1x256xf32>
    %cst_19 = arith.constant 1.000000e+00 : f32
    %38 = vector.broadcast %cst_19 : f32 to vector<1x256xf32>
    %39 = arith.select %37, %38, %35 : vector<1x256xi1>, vector<1x256xf32>
    %cst_20 = arith.constant 1.000000e+00 : f32
    %40 = vector.broadcast %cst_20 : f32 to vector<1x256xf32>
    %41 = arith.addf %40, %35 : vector<1x256xf32>
    %42 = tpu.reciprocal %41 {approx = true} : vector<1x256xf32> -> vector<1x256xf32>
    %43 = arith.mulf %39, %42 : vector<1x256xf32>
    %c0_21 = arith.constant 0 : index
    %c0_22 = arith.constant 0 : index
    %c0_23 = arith.constant 0 : index
    %44 = vector.load %arg8[%c0_21, %c0_22, %c0_23] : memref<1x1x256xf32, #tpu.memory_space<vmem>>, vector<1x1x256xf32>
    %45 = vector.shape_cast %44 : vector<1x1x256xf32> to vector<1x256xf32>
    %46 = vector.shape_cast %43 : vector<1x256xf32> to vector<1x1x256xf32>
    tpu.vector_store %arg8[%c0_21, %c0_22, %c0_23], %46 {strides = array<i32>} : memref<1x1x256xf32, #tpu.memory_space<vmem>>, vector<1x1x256xf32>,
    return
  }
  func.func @transform_0(%arg0: i32) -> (i32, i32) {
    %c0_i32 = arith.constant 0 : i32
    %c0_i32_0 = arith.constant 0 : i32
    return %arg0, %c0_i32 : i32, i32
  }
  func.func @transform_1(%arg0: i32) -> (i32, i32) {
    %c0_i32 = arith.constant 0 : i32
    %c0_i32_0 = arith.constant 0 : i32
    %c0_i32_1 = arith.constant 0 : i32
    return %c0_i32, %c0_i32_0 : i32, i32
  }
  func.func @transform_2(%arg0: i32) -> (i32, i32) {
    %c0_i32 = arith.constant 0 : i32
    %c0_i32_0 = arith.constant 0 : i32
    %c0_i32_1 = arith.constant 0 : i32
    return %c0_i32, %c0_i32_0 : i32, i32
  }
  func.func @transform_3(%arg0: i32) -> (i32, i32) {
    %c0_i32 = arith.constant 0 : i32
    %c0_i32_0 = arith.constant 0 : i32
    %c0_i32_1 = arith.constant 0 : i32
    return %c0_i32, %c0_i32_0 : i32, i32
  }
  func.func @transform_4(%arg0: i32) -> (i32, i32) {
    %c0_i32 = arith.constant 0 : i32
    %c0_i32_0 = arith.constant 0 : i32
    %c0_i32_1 = arith.constant 0 : i32
    return %c0_i32, %c0_i32_0 : i32, i32
  }
  func.func @transform_5(%arg0: i32) -> (i32, i32) {
    %c0_i32 = arith.constant 0 : i32
    %c0_i32_0 = arith.constant 0 : i32
    %c0_i32_1 = arith.constant 0 : i32
    return %c0_i32, %c0_i32_0 : i32, i32
  }
  func.func @transform_6(%arg0: i32) -> (i32, i32) {
    %c0_i32 = arith.constant 0 : i32
    %c0_i32_0 = arith.constant 0 : i32
    %c0_i32_1 = arith.constant 0 : i32
    return %c0_i32, %c0_i32_0 : i32, i32
  }
  func.func @transform_7(%arg0: i32) -> (i32, i32, i32) {
    %c0_i32 = arith.constant 0 : i32
    %c0_i32_0 = arith.constant 0 : i32
    %c0_i32_1 = arith.constant 0 : i32
    return %arg0, %c0_i32, %c0_i32_0 : i32, i32, i32
  }
}

</mosaic_0001>

<bundles_post_ra>
// kernel: discriminator_forward.1
= control target key start
LH: loop header
LB: loop body
LE: loop exit
PB: predicated region body
PF: predicated region fallthrough
CT: control target
= control target key end

     0   :  { %s1633_s0 = inlined_call_operand.vmem [shape: f32[256,2], index: 0, kind: input, shape index: {}]   ;;  %s1634_s1 = inlined_call_operand.vmem [shape: f32[2,128], index: 1, kind: input, shape index: {}]   ;;  %s1635_s2 = inlined_call_operand.vmem [shape: f32[1,128], index: 2, kind: input, shape index: {}]   ;;  %s1636_s3 = inlined_call_operand.vmem [shape: bf16[128,128], index: 3, kind: input, shape index: {}]   ;;  %s1637_s4 = inlined_call_operand.vmem [shape: f32[1,128], index: 4, kind: input, shape index: {}]   ;;  %s1638_s5 = inlined_call_operand.vmem [shape: f32[1,128], index: 5, kind: input, shape index: {}]   ;;  %s1639_s6 = inlined_call_operand.<no memory space> [shape: f32[1,1], index: 6, kind: input, shape index: {}]   ;;  %s1640_s7 = inlined_call_operand.hbm [shape: f32[1,1,256], index: 7, kind: output, shape index: {}]  }
   0x1   :  { %v12_v0 = vstv %s1639_s6 }
   0x2   :  { %13 = vst [vmem:[#allocation2] sm:$0x1] %v12_v0 }
   0x3   :  { %v32_v1 = vld [vmem:[%s1633_s0 + $0x10] sm:$0xff]  ;;  %v30_v2 = vld [vmem:[%s1633_s0] sm:$0xff]  ;;  %v1226_v3 = vmov 0   ;;  %v33_v4 = vld [vmem:[%s1633_s0 + $0x18] sm:$0xff]  ;;  %v1227_v7 = vmov 1  }
   0x4   :  { %1163 = vset.pattern.permute.xlu1 %v1226_v3  ;;  %1162 = vset.pattern.permute.xlu0 %v1226_v3  ;;  %v31_v5 = vld [vmem:[%s1633_s0 + $0x8] sm:$0xff]  ;;  %v1186_v8 = vld [vmem:[%s1636_s3] sm:$0xff]   ;;  %v1188_v12 = vld [vmem:[%s1636_s3 + $0x10] sm:$0xff]  }
   0x5   :  { %76 = vperm.xlu1 %1163, %v32_v1   ;;  %66 = vperm.xlu0 %1162, %v30_v2   ;;  %v35_v6 = vld [vmem:[%s1633_s0 + $0x28] sm:$0xff] }
   0x6   :  { %v39_v9 = vld [vmem:[%s1633_s0 + $0x48] sm:$0xff]  ;;  %1078 = vmatprep.subr.bf16.mxu0 %v1186_v8 }
   0x7   :  { %v1187_v10 = vld [vmem:[%s1636_s3 + $0x8] sm:$0xff]   ;;  %1079 = vmatpush3.bf16.msra.mxu0 %v1186_v8 }
   0x8   :  { %v1303_v11 = vld [vmem:[%s1633_s0 + $0x68] sm:$0xff]  ;;  %1080 = vmatprep.subr.bf16.mxu0 %v1187_v10 }
   0x9   :  { %81 = vperm.xlu1 %1163, %v33_v4   ;;  %71 = vperm.xlu0 %1162, %v31_v5  }
   0xd   :  { %1164 = vset.pattern.permute.xlu1 %v1227_v7  ;;  %91 = vperm.xlu0 %1162, %v35_v6  }
   0xe   :  { %304 = vperm.xlu1 %1164, %v31_v5  }
  0x11   :  { %111 = vperm.xlu0 %1162, %v39_v9  }
  0x12   :  { %308 = vperm.xlu1 %1164, %v32_v1  }
  0x13   :  { %14 = vsyncpa [#allocation4], 0  ;;  %v34_v13 = vld [vmem:[%s1633_s0 + $0x20] sm:$0xff]  ;;  %1081 = vmatpush3.bf16.msra.mxu0 %v1187_v10  ;;  %v1316_v14 = vld [vmem:[%s1633_s0 + $0x88] sm:$0xff] }
  0x14   :  { %1082 = vmatprep.subr.bf16.mxu0 %v1188_v12  ;;  %v1189_v15 = vld [vmem:[%s1636_s3 + $0x18] sm:$0xff]   ;;  %v36_v16 = vld [vmem:[%s1633_s0 + $0x30] sm:$0xff]  ;;  %v1190_v17 = vld [vmem:[%s1636_s3 + $0x20] sm:$0xff]  }
  0x15   :  { %131 = vperm.xlu0 %1162, %v1303_v11   ;;  %v37_v18 = vld [vmem:[%s1633_s0 + $0x38] sm:$0xff]  ;;  %v1191_v19 = vld [vmem:[%s1636_s3 + $0x28] sm:$0xff]   ;;  %v1192_v20 = vld [vmem:[%s1636_s3 + $0x30] sm:$0xff]  }
  0x16   :  { %1165 = vset.pattern.permute.xlu1 %v1226_v3  ;;  %v1193_v21 = vld [vmem:[%s1636_s3 + $0x38] sm:$0xff]   ;;  %v38_v22 = vld [vmem:[%s1633_s0 + $0x40] sm:$0xff]  ;;  %v40_v23 = vld [vmem:[%s1633_s0 + $0x50] sm:$0xff] }
  0x17   :  { %86 = vperm.xlu1 %1165, %v34_v13   ;;  %1083 = vmatpush3.bf16.msra.mxu0 %v1188_v12  ;;  %v41_v24 = vld [vmem:[%s1633_s0 + $0x58] sm:$0xff]  ;;  %v42_v25 = vld [vmem:[%s1633_s0 + $0x60] sm:$0xff]  ;;  %v44_v30 = vld [vmem:[%s1633_s0 + $0x70] sm:$0xff] }
  0x18   :  { %1084 = vmatprep.subr.bf16.mxu0 %v1189_v15  ;;  %v45_v26 = vld [vmem:[%s1633_s0 + $0x78] sm:$0xff]  ;;  %v46_v27 = vld [vmem:[%s1633_s0 + $0x80] sm:$0xff]  ;;  %v51_v32 = vld [vmem:[%s1633_s0 + $0xa8] sm:$0xff] }
  0x19   :  { %151 = vperm.xlu0 %1162, %v1316_v14   ;;  %v49_v28 = vld [vmem:[%s1633_s0 + $0x98] sm:$0xff]  ;;  %v50_v29 = vld [vmem:[%s1633_s0 + $0xa0] sm:$0xff]  ;;  %v55_v33 = vld [vmem:[%s1633_s0 + $0xc8] sm:$0xff] }
  0x1a   :  { %v53_v31 = vld [vmem:[%s1633_s0 + $0xb8] sm:$0xff]  ;;  %v54_v34 = vld [vmem:[%s1633_s0 + $0xc0] sm:$0xff]  ;;  %v48_v35 = vld [vmem:[%s1633_s0 + $0x90] sm:$0xff] }
  0x1b   :  { %96 = vperm.xlu1 %1165, %v36_v16   ;;  %1085 = vmatpush3.bf16.msra.mxu0 %v1189_v15  ;;  %v57_v36 = vld [vmem:[%s1633_s0 + $0xd8] sm:$0xff]  ;;  %v1398_v37 = vld [vmem:[%s1633_s0 + $0xe8] sm:$0xff]  ;;  %v58_v38 = vld [vmem:[%s1633_s0 + $0xe0] sm:$0xff] }
  0x1c   :  { %1086 = vmatprep.subr.bf16.mxu0 %v1190_v17  ;;  %v1411_v39 = vld [vmem:[%s1633_s0 + $0xf8] sm:$0xff]  ;;  %v52_v40 = vld [vmem:[%s1633_s0 + $0xb0] sm:$0xff]  ;;  %v1430_v50 = vld [vmem:[%s1634_s1] ss:$0 sm:$0xff] }
  0x1d   :  { %1172 = vset.pattern.permute.xlu0 %v1227_v7  ;;  %v56_v43 = vld [vmem:[%s1633_s0 + $0xd0] sm:$0xff]  ;;  %v1438_v53 = vld [vmem:[%s1634_s1 + $0x1] ss:$0 sm:$0xff]  ;;  %v1443_v55 = vld [vmem:[%s1635_s2] ss:$0 sm:$0xff] }
  0x1e   :  { %300 = vperm.xlu0 %1172, %v30_v2   ;;  %v60_v0 = vld [vmem:[%s1633_s0 + $0xf0] sm:$0xff] }
  0x1f   :  { %101 = vperm.xlu1 %1165, %v37_v18   ;;  %1087 = vmatpush3.bf16.msra.mxu0 %v1190_v17 }
  0x20   :  { %1088 = vmatprep.subr.bf16.mxu0 %v1191_v19 }
  0x22   :  { %312 = vperm.xlu0 %1172, %v33_v4  }
  0x23   :  { %1166 = vset.pattern.permute.xlu1 %v1227_v7  ;;  %1089 = vmatpush3.bf16.msra.mxu0 %v1191_v19 }
  0x24   :  { %320 = vperm.xlu1 %1166, %v35_v6   ;;  %1090 = vmatprep.subr.bf16.mxu0 %v1192_v20 }
  0x26   :  { %316 = vperm.xlu0 %1172, %v34_v13  }
  0x27   :  { %1091 = vmatpush3.bf16.msra.mxu0 %v1192_v20 }
  0x28   :  { %324 = vperm.xlu1 %1166, %v36_v16   ;;  %1092 = vmatprep.subr.bf16.mxu0 %v1193_v21 }
  0x2a   :  { %328 = vperm.xlu0 %1172, %v37_v18  }
  0x2b   :  { %1093 = vmatpush3.bf16.msra.mxu0 %v1193_v21 }
  0x2c   :  { %1167 = vset.pattern.permute.xlu1 %v1226_v3 }
  0x2d   :  { %106 = vperm.xlu1 %1167, %v38_v22  }
  0x2e   :  { %332 = vperm.xlu0 %1172, %v38_v22  }
  0x31   :  { %116 = vperm.xlu1 %1167, %v40_v23  }
  0x32   :  { %344 = vperm.xlu0 %1172, %v41_v24  }
  0x35   :  { %121 = vperm.xlu1 %1167, %v41_v24  }
  0x36   :  { %348 = vperm.xlu0 %1172, %v42_v25  }
  0x39   :  { %1168 = vset.pattern.permute.xlu1 %v1227_v7 }
  0x3a   :  { %336 = vperm.xlu1 %1168, %v39_v9   ;;  %360 = vperm.xlu0 %1172, %v45_v26  }
  0x3e   :  { %340 = vperm.xlu1 %1168, %v40_v23   ;;  %364 = vperm.xlu0 %1172, %v46_v27  }
  0x42   :  { %1169 = vset.pattern.permute.xlu1 %v1226_v3  ;;  %376 = vperm.xlu0 %1172, %v49_v28  }
  0x43   :  { %126 = vperm.xlu1 %1169, %v42_v25  }
  0x46   :  { %380 = vperm.xlu0 %1172, %v50_v29  }
  0x47   :  { %136 = vperm.xlu1 %1169, %v44_v30  }
  0x4a   :  { %392 = vperm.xlu0 %1172, %v53_v31  }
  0x4b   :  { %141 = vperm.xlu1 %1169, %v45_v26  }
  0x4e   :  { %1176 = vset.pattern.permute.xlu0 %v1226_v3 }
  0x4f   :  { %1170 = vset.pattern.permute.xlu1 %v1227_v7  ;;  %171 = vperm.xlu0 %1176, %v51_v32  }
  0x50   :  { %352 = vperm.xlu1 %1170, %v1303_v11  }
  0x53   :  { %191 = vperm.xlu0 %1176, %v55_v33  }
  0x54   :  { %356 = vperm.xlu1 %1170, %v44_v30  }
  0x57   :  { %1178 = vset.pattern.permute.xlu0 %v1227_v7 }
  0x58   :  { %1171 = vset.pattern.permute.xlu1 %v1226_v3  ;;  %396 = vperm.xlu0 %1178, %v54_v34  }
  0x59   :  { %146 = vperm.xlu1 %1171, %v46_v27  }
  0x5c   :  { %408 = vperm.xlu0 %1178, %v57_v36  }
  0x5d   :  { %156 = vperm.xlu1 %1171, %v48_v35  }
  0x60   :  { %1181 = vset.pattern.permute.xlu0 %v1226_v3 }
  0x61   :  { %161 = vperm.xlu1 %1171, %v49_v28   ;;  %211 = vperm.xlu0 %1181, %v1398_v37  }
  0x65   :  { %1173 = vset.pattern.permute.xlu1 %v1227_v7  ;;  %1182 = vset.pattern.permute.xlu0 %v1227_v7 }
  0x66   :  { %368 = vperm.xlu1 %1173, %v1316_v14   ;;  %412 = vperm.xlu0 %1182, %v58_v38  }
  0x6a   :  { %372 = vperm.xlu1 %1173, %v48_v35   ;;  %424 = vperm.xlu0 %1182, %v1411_v39  }
  0x6e   :  { %1174 = vset.pattern.permute.xlu1 %v1226_v3  ;;  %1185 = vset.pattern.permute.xlu0 %v1226_v3 }
  0x6f   :  { %166 = vperm.xlu1 %1174, %v50_v29  }
  0x73   :  { %176 = vperm.xlu1 %1174, %v52_v40  }
  0x77   :  { %181 = vperm.xlu1 %1174, %v53_v31  }
  0x7b   :  { %1175 = vset.pattern.permute.xlu1 %v1227_v7 }
  0x7c   :  { %384 = vperm.xlu1 %1175, %v51_v32  }
  0x80   :  { %388 = vperm.xlu1 %1175, %v52_v40  }
  0x84   :  { %v77_v41 = vpop.permute.xlu1 %76  ;;  %1177 = vset.pattern.permute.xlu1 %v1226_v3  ;;  %v67_v42 = vpop.permute.xlu0 %66 }
  0x85   :  { %186 = vperm.xlu1 %1177, %v54_v34   ;;  %v228_v56 = vmul.f32 %v1430_v50, %v67_v42  ;;  %v230_v61 = vmul.f32 %v1430_v50, %v77_v41 }
  0x87   :  { %v266_v62 = vadd.f32 %v1443_v55, %v228_v56  ;;  %v268_v9 = vadd.f32 %v1443_v55, %v230_v61 }
  0x88   :  { %v82_v44 = vpop.permute.xlu1 %81  ;;  %v72_v45 = vpop.permute.xlu0 %71 }
  0x89   :  { %196 = vperm.xlu1 %1177, %v56_v43   ;;  %v229_v51 = vmul.f32 %v1430_v50, %v72_v45  ;;  %v231_v4 = vmul.f32 %v1430_v50, %v82_v44 }
  0x8b   :  { %v267_v57 = vadd.f32 %v1443_v55, %v229_v51  ;;  %v269_v15 = vadd.f32 %v1443_v55, %v231_v4 }
  0x8c   :  { %v92_v46 = vpop.permute.xlu0 %91 }
  0x8d   :  { %201 = vperm.xlu1 %1177, %v57_v36   ;;  %v305_v47 = vpop.permute.xlu1 %304  ;;  %v233_v5 = vmul.f32 %v1430_v50, %v92_v46 }
  0x8e   :  { %v432_v58 = vmul.f32 %v1438_v53, %v305_v47 }
  0x8f   :  { %v271_v16 = vadd.f32 %v1443_v55, %v233_v5 }
  0x90   :  { %v1424_v48 = vpop.permute.xlu0 %111  ;;  %v464_v63 = vadd.f32 %v432_v58, %v267_v57 }
  0x91   :  { %1179 = vset.pattern.permute.xlu1 %v1227_v7  ;;  %v309_v49 = vpop.permute.xlu1 %308 }
  0x92   :  { %400 = vperm.xlu1 %1179, %v55_v33   ;;  %v433_v1 = vmul.f32 %v1438_v53, %v309_v49  ;;  %v496_v11 = vmul.f32 0.2, %v464_v63 }
  0x94   :  { %v1433_v52 = vpop.permute.xlu0 %131  ;;  %v465_v12 = vadd.f32 %v433_v1, %v268_v9  ;;  %v528_v24 = vmax.f32 %v464_v63, %v496_v11  ;;  %v237_v1 = vmul.f32 %v1430_v50, %v1424_v48 }
  0x96   :  { %404 = vperm.xlu1 %1179, %v56_v43   ;;  %v87_v54 = vpop.permute.xlu1 %86  ;;  %v497_v25 = vmul.f32 0.2, %v465_v12 }
  0x97   :  { %v232_v13 = vmul.f32 %v1430_v50, %v87_v54 }
  0x98   :  { %v1448_v59 = vpop.permute.xlu0 %151  ;;  %v529_v40 = vmax.f32 %v465_v12, %v497_v25 }
  0x99   :  { %v270_v26 = vadd.f32 %v1443_v55, %v232_v13 }
  0x9a   :  { %1180 = vset.pattern.permute.xlu1 %v1226_v3  ;;  %v97_v60 = vpop.permute.xlu1 %96 }
  0x9b   :  { %206 = vperm.xlu1 %1180, %v58_v38   ;;  %v234_v19 = vmul.f32 %v1430_v50, %v97_v60 }
  0x9d   :  { %v301_v2 = vpop.permute.xlu0 %300  ;;  %v272_v33 = vadd.f32 %v1443_v55, %v234_v19 }
  0x9e   :  { %v431_v6 = vmul.f32 %v1438_v53, %v301_v2  ;;  %v102_v8 = vpop.permute.xlu1 %101 }
  0x9f   :  { %216 = vperm.xlu1 %1180, %v60_v0   ;;  %v235_v27 = vmul.f32 %v1430_v50, %v102_v8  ;;  %v275_v8 = vadd.f32 %v1443_v55, %v237_v1 }
  0xa0   :  { %v463_v10 = vadd.f32 %v431_v6, %v266_v62 }
  0xa1   :  { %v313_v14 = vpop.permute.xlu0 %312  ;;  %v273_v42 = vadd.f32 %v1443_v55, %v235_v27 }
  0xa2   :  { %v434_v17 = vmul.f32 %v1438_v53, %v313_v14  ;;  %v495_v18 = vmul.f32 0.2, %v463_v10 }
  0xa3   :  { %221 = vperm.xlu1 %1180, %v1411_v39   ;;  %v321_v20 = vpop.permute.xlu1 %320 }
  0xa4   :  { %v466_v21 = vadd.f32 %v434_v17, %v269_v15  ;;  %v436_v22 = vmul.f32 %v1438_v53, %v321_v20  ;;  %v527_v23 = vmax.f32 %v463_v10, %v495_v18 }
  0xa5   :  { %v317_v28 = vpop.permute.xlu0 %316 }
  0xa6   :  { %v498_v29 = vmul.f32 0.2, %v466_v21  ;;  %v468_v30 = vadd.f32 %v436_v22, %v271_v16  ;;  %v435_v31 = vmul.f32 %v1438_v53, %v317_v28  ;;  %v559_v32 = vpack.c.bf16 %v528_v24, %v527_v23 }
  0xa7   :  { %1183 = vset.pattern.permute.xlu1 %v1227_v7  ;;  %v325_v34 = vpop.permute.xlu1 %324 }
  0xa8   :  { %v530_v35 = vmax.f32 %v466_v21, %v498_v29  ;;  %v500_v36 = vmul.f32 0.2, %v468_v30  ;;  %v467_v38 = vadd.f32 %v435_v31, %v270_v26  ;;  %v437_v39 = vmul.f32 %v1438_v53, %v325_v34  ;;  %416 = vperm.xlu1 %1183, %v1398_v37   ;;  %1094 = vmatprep.mubr.bf16.mxu0 %v559_v32 }
  0xa9   :  { %v329_v41 = vpop.permute.xlu0 %328 }
  0xaa   :  { %v499_v43 = vmul.f32 0.2, %v467_v38  ;;  %v469_v44 = vadd.f32 %v437_v39, %v272_v33  ;;  %v438_v45 = vmul.f32 %v1438_v53, %v329_v41  ;;  %v560_v46 = vpack.c.bf16 %v530_v35, %v529_v40 }
  0xab   :  { %v532_v47 = vmax.f32 %v468_v30, %v500_v36 }
  0xac   :  { %v531_v7 = vmax.f32 %v467_v38, %v499_v43  ;;  %v501_v49 = vmul.f32 0.2, %v469_v44  ;;  %v470_v51 = vadd.f32 %v438_v45, %v273_v42  ;;  %420 = vperm.xlu1 %1183, %v60_v0   ;;  %v107_v54 = vpop.permute.xlu1 %106  ;;  %1095 = vmatmul.mubr.bf16.vlgmr.msra.gmra.mrb[0].mxu0 %v560_v46  ;;  %v241_v38 = vmul.f32 %v1430_v50, %v1433_v52 }
  0xad   :  { %v236_v60 = vmul.f32 %v1430_v50, %v107_v54  ;;  %v333_v62 = vpop.permute.xlu0 %332 }
  0xae   :  { %v502_v56 = vmul.f32 0.2, %v470_v51  ;;  %v561_v57 = vpack.c.bf16 %v532_v47, %v531_v7  ;;  %v533_v37 = vmax.f32 %v469_v44, %v501_v49  ;;  %v439_v0 = vmul.f32 %v1438_v53, %v333_v62 }
  0xaf   :  { %v274_v2 = vadd.f32 %v1443_v55, %v236_v60  ;;  %v279_v44 = vadd.f32 %v1443_v55, %v241_v38 }
  0xb0   :  { %v534_v58 = vmax.f32 %v470_v51, %v502_v56  ;;  %v117_v61 = vpop.permute.xlu1 %116  ;;  %1098 = vmatprep.mubr.bf16.mxu0 %v561_v57  ;;  %1184 = vset.pattern.permute.xlu1 %v1226_v3 }
  0xb1   :  { %v345_v6 = vpop.permute.xlu0 %344  ;;  %v471_v9 = vadd.f32 %v439_v0, %v274_v2  ;;  %v238_v12 = vmul.f32 %v1430_v50, %v117_v61 }
  0xb2   :  { %v562_v63 = vpack.c.bf16 %v534_v58, %v533_v37  ;;  %v442_v3 = vmul.f32 %v1438_v53, %v345_v6 }
  0xb3   :  { %v503_v13 = vmul.f32 0.2, %v471_v9  ;;  %v276_v17 = vadd.f32 %v1443_v55, %v238_v12 }
  0xb4   :  { %v122_v4 = vpop.permute.xlu1 %121  ;;  %1099 = vmatmul.mubr.bf16.gmra.mrb[4].mxu0 %v562_v63 }
  0xb5   :  { %v239_v5 = vmul.f32 %v1430_v50, %v122_v4  ;;  %v535_v20 = vmax.f32 %v471_v9, %v503_v13  ;;  %v349_v32 = vpop.permute.xlu0 %348 }
  0xb6   :  { %v443_v34 = vmul.f32 %v1438_v53, %v349_v32 }
  0xb7   :  { %v277_v10 = vadd.f32 %v1443_v55, %v239_v5 }
  0xb9   :  { %v337_v11 = vpop.permute.xlu1 %336  ;;  %v474_v14 = vadd.f32 %v442_v3, %v277_v10  ;;  %v361_v39 = vpop.permute.xlu0 %360  ;;  %v245_v3 = vmul.f32 %v1430_v50, %v1448_v59 }
  0xba   :  { %v440_v48 = vmul.f32 %v1438_v53, %v337_v11  ;;  %v446_v41 = vmul.f32 %v1438_v53, %v361_v39 }
  0xbb   :  { %v506_v21 = vmul.f32 0.2, %v474_v14 }
  0xbc   :  { %v472_v15 = vadd.f32 %v440_v48, %v275_v8 }
  0xbd   :  { %v341_v16 = vpop.permute.xlu1 %340  ;;  %v538_v27 = vmax.f32 %v474_v14, %v506_v21  ;;  %v365_v6 = vpop.permute.xlu0 %364 }
  0xbe   :  { %v504_v18 = vmul.f32 0.2, %v472_v15  ;;  %v441_v19 = vmul.f32 %v1438_v53, %v341_v16  ;;  %v447_v11 = vmul.f32 %v1438_v53, %v365_v6 }
  0xc0   :  { %v536_v22 = vmax.f32 %v472_v15, %v504_v18  ;;  %v473_v23 = vadd.f32 %v441_v19, %v276_v17  ;;  %v283_v15 = vadd.f32 %v1443_v55, %v245_v3 }
  0xc1   :  { %v377_v12 = vpop.permute.xlu0 %376 }
  0xc2   :  { %v505_v24 = vmul.f32 0.2, %v473_v23  ;;  %v127_v25 = vpop.permute.xlu1 %126  ;;  %v563_v26 = vpack.c.bf16 %v536_v22, %v535_v20  ;;  %v450_v16 = vmul.f32 %v1438_v53, %v377_v12 }
  0xc3   :  { %v240_v29 = vmul.f32 %v1430_v50, %v127_v25 }
  0xc4   :  { %v537_v28 = vmax.f32 %v473_v23, %v505_v24  ;;  %1102 = vmatprep.mubr.bf16.mxu0 %v563_v26 }
  0xc5   :  { %v278_v33 = vadd.f32 %v1443_v55, %v240_v29  ;;  %v381_v22 = vpop.permute.xlu0 %380 }
  0xc6   :  { %v137_v30 = vpop.permute.xlu1 %136  ;;  %v564_v31 = vpack.c.bf16 %v538_v27, %v537_v28 }
  0xc7   :  { %v475_v40 = vadd.f32 %v443_v34, %v278_v33  ;;  %v242_v45 = vmul.f32 %v1430_v50, %v137_v30 }
  0xc8   :  { %1103 = vmatmul.mubr.bf16.gmra.mrb[8].mxu0 %v564_v31 }
  0xc9   :  { %v507_v47 = vmul.f32 0.2, %v475_v40  ;;  %v280_v54 = vadd.f32 %v1443_v55, %v242_v45  ;;  %v393_v33 = vpop.permute.xlu0 %392  ;;  %v451_v45 = vmul.f32 %v1438_v53, %v381_v22 }
  0xca   :  { %v142_v35 = vpop.permute.xlu1 %141 }
  0xcb   :  { %v243_v36 = vmul.f32 %v1430_v50, %v142_v35  ;;  %v539_v57 = vmax.f32 %v475_v40, %v507_v47 }
  0xcd   :  { %v281_v42 = vadd.f32 %v1443_v55, %v243_v36 }
  0xce   :  { %v172_v40 = vpop.permute.xlu0 %171 }
  0xcf   :  { %v353_v43 = vpop.permute.xlu1 %352  ;;  %v478_v7 = vadd.f32 %v446_v41, %v281_v42 }
  0xd0   :  { %v444_v46 = vmul.f32 %v1438_v53, %v353_v43  ;;  %v249_v43 = vmul.f32 %v1430_v50, %v172_v40 }
  0xd1   :  { %v510_v37 = vmul.f32 0.2, %v478_v7 }
  0xd2   :  { %v476_v49 = vadd.f32 %v444_v46, %v279_v44 }
  0xd3   :  { %v357_v51 = vpop.permute.xlu1 %356  ;;  %v542_v2 = vmax.f32 %v478_v7, %v510_v37  ;;  %v287_v7 = vadd.f32 %v1443_v55, %v249_v43 }
  0xd4   :  { %v508_v52 = vmul.f32 0.2, %v476_v49  ;;  %v445_v56 = vmul.f32 %v1438_v53, %v357_v51  ;;  %v454_v51 = vmul.f32 %v1438_v53, %v393_v33 }
  0xd6   :  { %v540_v58 = vmax.f32 %v476_v49, %v508_v52  ;;  %v477_v60 = vadd.f32 %v445_v56, %v280_v54 }
  0xd8   :  { %v509_v61 = vmul.f32 0.2, %v477_v60  ;;  %v147_v62 = vpop.permute.xlu1 %146  ;;  %v565_v63 = vpack.c.bf16 %v540_v58, %v539_v57 }
  0xd9   :  { %v244_v0 = vmul.f32 %v1430_v50, %v147_v62 }
  0xda   :  { %v541_v1 = vmax.f32 %v477_v60, %v509_v61  ;;  %1106 = vmatprep.mubr.bf16.mxu0 %v565_v63 }
  0xdb   :  { %v282_v8 = vadd.f32 %v1443_v55, %v244_v0 }
  0xdc   :  { %v157_v4 = vpop.permute.xlu1 %156  ;;  %v566_v5 = vpack.c.bf16 %v542_v2, %v541_v1 }
  0xdd   :  { %v479_v48 = vadd.f32 %v447_v11, %v282_v8  ;;  %v246_v17 = vmul.f32 %v1430_v50, %v157_v4  ;;  %v192_v4 = vpop.permute.xlu0 %191 }
  0xde   :  { %1107 = vmatmul.mubr.bf16.gmra.mrb[12].mxu0 %v566_v5 }
  0xdf   :  { %v511_v19 = vmul.f32 0.2, %v479_v48  ;;  %v284_v23 = vadd.f32 %v1443_v55, %v246_v17 }
  0xe0   :  { %v162_v9 = vpop.permute.xlu1 %161 }
  0xe1   :  { %v247_v10 = vmul.f32 %v1430_v50, %v162_v9  ;;  %v543_v29 = vmax.f32 %v479_v48, %v511_v19  ;;  %v397_v48 = vpop.permute.xlu0 %396 }
  0xe3   :  { %v285_v13 = vadd.f32 %v1443_v55, %v247_v10 }
  0xe5   :  { %v369_v14 = vpop.permute.xlu1 %368  ;;  %v482_v20 = vadd.f32 %v450_v16, %v285_v13  ;;  %v409_v17 = vpop.permute.xlu0 %408 }
  0xe6   :  { %v448_v18 = vmul.f32 %v1438_v53, %v369_v14  ;;  %v455_v14 = vmul.f32 %v1438_v53, %v397_v48 }
  0xe7   :  { %v514_v26 = vmul.f32 0.2, %v482_v20 }
  0xe8   :  { %v480_v21 = vadd.f32 %v448_v18, %v283_v15  ;;  %v253_v18 = vmul.f32 %v1430_v50, %v192_v4 }
  0xe9   :  { %v373_v59 = vpop.permute.xlu1 %372  ;;  %v546_v35 = vmax.f32 %v482_v20, %v514_v26 }
  0xea   :  { %v512_v24 = vmul.f32 0.2, %v480_v21  ;;  %v449_v25 = vmul.f32 %v1438_v53, %v373_v59  ;;  %v291_v59 = vadd.f32 %v1443_v55, %v253_v18 }
  0xec   :  { %v544_v27 = vmax.f32 %v480_v21, %v512_v24  ;;  %v481_v28 = vadd.f32 %v449_v25, %v284_v23  ;;  %v458_v21 = vmul.f32 %v1438_v53, %v409_v17 }
  0xee   :  { %v513_v30 = vmul.f32 0.2, %v481_v28  ;;  %v167_v31 = vpop.permute.xlu1 %166  ;;  %v567_v32 = vpack.c.bf16 %v544_v27, %v543_v29 }
  0xef   :  { %v248_v36 = vmul.f32 %v1430_v50, %v167_v31 }
  0xf0   :  { %v545_v34 = vmax.f32 %v481_v28, %v513_v30  ;;  %1110 = vmatprep.mubr.bf16.mxu0 %v567_v32 }
  0xf1   :  { %v286_v41 = vadd.f32 %v1443_v55, %v248_v36  ;;  %v212_v36 = vpop.permute.xlu0 %211 }
  0xf2   :  { %v177_v38 = vpop.permute.xlu1 %176  ;;  %v568_v39 = vpack.c.bf16 %v546_v35, %v545_v34 }
  0xf3   :  { %v483_v46 = vadd.f32 %v451_v45, %v286_v41  ;;  %v250_v54 = vmul.f32 %v1430_v50, %v177_v38 }
  0xf4   :  { %1111 = vmatmul.mubr.bf16.gmra.mrb[16].mxu0 %v568_v39 }
  0xf5   :  { %v515_v56 = vmul.f32 0.2, %v483_v46  ;;  %v288_v60 = vadd.f32 %v1443_v55, %v250_v54 }
  0xf6   :  { %v182_v42 = vpop.permute.xlu1 %181 }
  0xf7   :  { %v251_v44 = vmul.f32 %v1430_v50, %v182_v42  ;;  %v547_v0 = vmax.f32 %v483_v46, %v515_v56  ;;  %v413_v46 = vpop.permute.xlu0 %412 }
  0xf9   :  { %v289_v47 = vadd.f32 %v1443_v55, %v251_v44 }
  0xfb   :  { %v385_v49 = vpop.permute.xlu1 %384  ;;  %v486_v57 = vadd.f32 %v454_v51, %v289_v47  ;;  %v425_v54 = vpop.permute.xlu0 %424 }
  0xfc   :  { %v452_v52 = vmul.f32 %v1438_v53, %v385_v49 }
  0xfd   :  { %v518_v63 = vmul.f32 0.2, %v486_v57 }
  0xfe   :  { %v484_v37 = vadd.f32 %v452_v52, %v287_v7  ;;  %v459_v7 = vmul.f32 %v1438_v53, %v413_v46  ;;  %v257_v52 = vmul.f32 %v1430_v50, %v212_v36 }
  0xff   :  { %v389_v58 = vpop.permute.xlu1 %388  ;;  %v550_v10 = vmax.f32 %v486_v57, %v518_v63 }
 0x100   :  { %v516_v61 = vmul.f32 0.2, %v484_v37  ;;  %v453_v62 = vmul.f32 %v1438_v53, %v389_v58 }
 0x102   :  { %v548_v1 = vmax.f32 %v484_v37, %v516_v61  ;;  %v485_v2 = vadd.f32 %v453_v62, %v288_v60  ;;  %v462_v37 = vmul.f32 %v1438_v53, %v425_v54  ;;  %v295_v60 = vadd.f32 %v1443_v55, %v257_v52 }
 0x104   :  { %v517_v5 = vmul.f32 0.2, %v485_v2  ;;  %v187_v6 = vpop.permute.xlu1 %186  ;;  %v569_v8 = vpack.c.bf16 %v548_v1, %v547_v0 }
 0x105   :  { %v252_v3 = vmul.f32 %v1430_v50, %v187_v6 }
 0x106   :  { %v549_v9 = vmax.f32 %v485_v2, %v517_v5  ;;  %1114 = vmatprep.mubr.bf16.mxu0 %v569_v8 }
 0x107   :  { %v290_v13 = vadd.f32 %v1443_v55, %v252_v3 }
 0x108   :  { %v197_v11 = vpop.permute.xlu1 %196  ;;  %v570_v12 = vpack.c.bf16 %v550_v10, %v549_v9 }
 0x109   :  { %v487_v19 = vadd.f32 %v455_v14, %v290_v13  ;;  %v254_v23 = vmul.f32 %v1430_v50, %v197_v11  ;;  %v1556_v14 = vld [vmem:[%s1637_s4] ss:$0 sm:$0xff] }
 0x10a   :  { %1115 = vmatmul.mubr.bf16.gmra.mrb[20].mxu0 %v570_v12 }
 0x10b   :  { %v519_v25 = vmul.f32 0.2, %v487_v19  ;;  %v292_v29 = vadd.f32 %v1443_v55, %v254_v23 }
 0x10c   :  { %v202_v15 = vpop.permute.xlu1 %201 }
 0x10d   :  { %v255_v16 = vmul.f32 %v1430_v50, %v202_v15  ;;  %v551_v32 = vmax.f32 %v487_v19, %v519_v25 }
 0x10f   :  { %v293_v20 = vadd.f32 %v1443_v55, %v255_v16 }
 0x111   :  { %v401_v22 = vpop.permute.xlu1 %400  ;;  %v490_v26 = vadd.f32 %v458_v21, %v293_v20 }
 0x112   :  { %v456_v24 = vmul.f32 %v1438_v53, %v401_v22 }
 0x113   :  { %v522_v33 = vmul.f32 0.2, %v490_v26 }
 0x114   :  { %v488_v27 = vadd.f32 %v456_v24, %v291_v59 }
 0x115   :  { %v405_v28 = vpop.permute.xlu1 %404  ;;  %v554_v41 = vmax.f32 %v490_v26, %v522_v33 }
 0x116   :  { %v520_v30 = vmul.f32 0.2, %v488_v27  ;;  %v457_v31 = vmul.f32 %v1438_v53, %v405_v28 }
 0x118   :  { %v552_v34 = vmax.f32 %v488_v27, %v520_v30  ;;  %v489_v35 = vadd.f32 %v457_v31, %v292_v29 }
 0x11a   :  { %v521_v38 = vmul.f32 0.2, %v489_v35  ;;  %v207_v39 = vpop.permute.xlu1 %206  ;;  %v571_v40 = vpack.c.bf16 %v552_v34, %v551_v32 }
 0x11b   :  { %v256_v43 = vmul.f32 %v1430_v50, %v207_v39 }
 0x11c   :  { %v553_v42 = vmax.f32 %v489_v35, %v521_v38  ;;  %1118 = vmatprep.mubr.bf16.mxu0 %v571_v40 }
 0x11d   :  { %v294_v47 = vadd.f32 %v1443_v55, %v256_v43 }
 0x11e   :  { %v217_v44 = vpop.permute.xlu1 %216  ;;  %v572_v45 = vpack.c.bf16 %v554_v41, %v553_v42 }
 0x11f   :  { %v491_v56 = vadd.f32 %v459_v7, %v294_v47  ;;  %v258_v61 = vmul.f32 %v1430_v50, %v217_v44 }
 0x120   :  { %1119 = vmatmul.mubr.bf16.gmra.mrb[24].mxu0 %v572_v45 }
 0x121   :  { %v523_v63 = vmul.f32 0.2, %v491_v56  ;;  %v296_v4 = vadd.f32 %v1443_v55, %v258_v61 }
 0x122   :  { %v222_v49 = vpop.permute.xlu1 %221 }
 0x123   :  { %v259_v51 = vmul.f32 %v1430_v50, %v222_v49  ;;  %v555_v8 = vmax.f32 %v491_v56, %v523_v63 }
 0x125   :  { %v297_v57 = vadd.f32 %v1443_v55, %v259_v51 }
 0x127   :  { %v417_v58 = vpop.permute.xlu1 %416  ;;  %v494_v1 = vadd.f32 %v462_v37, %v297_v57 }
 0x128   :  { %v460_v62 = vmul.f32 %v1438_v53, %v417_v58 }
 0x129   :  { %v526_v9 = vmul.f32 0.2, %v494_v1 }
 0x12a   :  { %v492_v2 = vadd.f32 %v460_v62, %v295_v60  ;;  %v1580_v60 = vld [vmem:[%s1638_s5] sm:$0x1]  ;;  %s1229_s5 = smov [#allocation3]  }
 0x12b   :  { %v421_v0 = vpop.permute.xlu1 %420  ;;  %v558_v48 = vmax.f32 %v494_v1, %v526_v9  ;;  %1076 = vmatprep.mubr.f32.mxu1 %v1580_v60  ;;  %v872_v9 = vld [vmem:[#allocation2] sm:$0x1]  ;;  %s1000_s14 = sshll.u32 %s1229_s5, 4  ;;  %s1001_s14 = int_to_ptr.vmem [resolvable:$true] %s1000_s14 }
 0x12c   :  { %v524_v5 = vmul.f32 0.2, %v492_v2  ;;  %v461_v6 = vmul.f32 %v1438_v53, %v421_v0  ;;  %875 = vperm.xlu1 %1184, %v872_v9   ;;  %s1202_s15 = scalar_lea.vmem %s1001_s14, 32  ;;  %p1207_p1 = scmp.lt.s32.totalorder %s1001_s14, %s1001_s14 }
 0x12d   :  { %p1203_p0 = scmp.ne.s32.totalorder %s1001_s14, %s1202_s15  ;;  %p1208_p2 = scmp.lt.s32.totalorder %s1202_s15, %s1202_s15 }
 0x12e   :  { %v556_v10 = vmax.f32 %v492_v2, %v524_v5  ;;  %v493_v3 = vadd.f32 %v461_v6, %v296_v4 }
 0x12f   :  { %p1209_p3 = por %p1208_p2, %p1207_p1 }
 0x130   :  { %v525_v11 = vmul.f32 0.2, %v493_v3  ;;  %v573_v12 = vpack.c.bf16 %v556_v10, %v555_v8 }
 0x131   :  { %p1210_p4 = pnand %p1209_p3, %p1203_p0 }
 0x132   :  { %v557_v13 = vmax.f32 %v493_v3, %v525_v11  ;;  %1122 = vmatprep.mubr.bf16.mxu0 %v573_v12 }
 0x134   :  { %v574_v50 = vpack.c.bf16 %v558_v48, %v557_v13 }
 0x136   :  { %1123 = vmatmul.mubr.bf16.gmra.mrb[28].mxu0 %v574_v50 }
 0x17f   :  { %v1096_v55 = vpop.f32.mrb[0].mxu0 }
 0x180   :  { %v689_v15 = vadd.f32 %v1096_v55, %v1556_v14  ;;  %v680_v53 = vpop.f32.mrb[1].mxu0 }
 0x181   :  { %v681_v16 = vadd.f32 %v1556_v14, %v680_v53  ;;  %v1097_v17 = vpop.f32.mrb[2].mxu0 }
 0x182   :  { %v809_v18 = vmul.f32 0.2, %v689_v15  ;;  %v692_v19 = vadd.f32 %v1097_v17, %v1556_v14  ;;  %v683_v20 = vpop.f32.mrb[3].mxu0 }
 0x183   :  { %v807_v21 = vmul.f32 0.2, %v681_v16  ;;  %v684_v22 = vadd.f32 %v1556_v14, %v683_v20 }
 0x184   :  { %v810_v59 = vmul.f32 0.2, %v692_v19  ;;  %v841_v24 = vmax.f32 %v689_v15, %v809_v18 }
 0x185   :  { %v808_v23 = vmul.f32 0.2, %v684_v22  ;;  %v839_v26 = vmax.f32 %v681_v16, %v807_v21 }
 0x186   :  { %v842_v25 = vmax.f32 %v692_v19, %v810_v59 }
 0x187   :  { %v840_v27 = vmax.f32 %v684_v22, %v808_v23  ;;  %v1100_v28 = vpop.f32.mrb[4].mxu0 }
 0x188   :  { %v705_v29 = vadd.f32 %v1100_v28, %v1556_v14  ;;  %v696_v30 = vpop.f32.mrb[5].mxu0  ;;  %v1563_v31 = vpack.c.bf16 %v842_v25, %v841_v24 }
 0x189   :  { %v697_v32 = vadd.f32 %v1556_v14, %v696_v30  ;;  %v1101_v33 = vpop.f32.mrb[6].mxu0  ;;  %v1566_v34 = vpack.c.bf16 %v840_v27, %v839_v26 }
 0x18a   :  { %v813_v35 = vmul.f32 0.2, %v705_v29  ;;  %v708_v36 = vadd.f32 %v1101_v33, %v1556_v14  ;;  %v699_v38 = vpop.f32.mrb[7].mxu0 }
 0x18b   :  { %v811_v39 = vmul.f32 0.2, %v697_v32  ;;  %v700_v40 = vadd.f32 %v1556_v14, %v699_v38 }
 0x18c   :  { %v814_v41 = vmul.f32 0.2, %v708_v36  ;;  %v845_v43 = vmax.f32 %v705_v29, %v813_v35 }
 0x18d   :  { %v812_v42 = vmul.f32 0.2, %v700_v40  ;;  %v843_v45 = vmax.f32 %v697_v32, %v811_v39 }
 0x18e   :  { %v846_v44 = vmax.f32 %v708_v36, %v814_v41 }
 0x18f   :  { %v844_v46 = vmax.f32 %v700_v40, %v812_v42 }
 0x190   :  { %v1570_v47 = vpack.c.bf16 %v846_v44, %v845_v43 }
 0x191   :  { %v1572_v7 = vpack.c.bf16 %v844_v46, %v843_v45 }
 0x19b   :  { %v1104_v49 = vpop.f32.mrb[8].mxu0 }
 0x19c   :  { %v721_v51 = vadd.f32 %v1104_v49, %v1556_v14  ;;  %v712_v54 = vpop.f32.mrb[9].mxu0 }
 0x19d   :  { %v713_v52 = vadd.f32 %v1556_v14, %v712_v54  ;;  %v1105_v56 = vpop.f32.mrb[10].mxu0 }
 0x19e   :  { %v817_v57 = vmul.f32 0.2, %v721_v51  ;;  %v724_v37 = vadd.f32 %v1105_v56, %v1556_v14  ;;  %v715_v58 = vpop.f32.mrb[11].mxu0 }
 0x19f   :  { %v815_v61 = vmul.f32 0.2, %v713_v52  ;;  %v716_v62 = vadd.f32 %v1556_v14, %v715_v58 }
 0x1a0   :  { %v818_v63 = vmul.f32 0.2, %v724_v37  ;;  %v849_v2 = vmax.f32 %v721_v51, %v817_v57 }
 0x1a1   :  { %v816_v1 = vmul.f32 0.2, %v716_v62  ;;  %v847_v4 = vmax.f32 %v713_v52, %v815_v61 }
 0x1a2   :  { %v850_v0 = vmax.f32 %v724_v37, %v818_v63 }
 0x1a3   :  { %v848_v5 = vmax.f32 %v716_v62, %v816_v1 }
 0x1a4   :  { %v1584_v6 = vpack.c.bf16 %v850_v0, %v849_v2 }
 0x1a5   :  { %v1586_v8 = vpack.c.bf16 %v848_v5, %v847_v4 }
 0x1b1   :  { %v1108_v10 = vpop.f32.mrb[12].mxu0 }
 0x1b2   :  { %v737_v3 = vadd.f32 %v1108_v10, %v1556_v14  ;;  %v728_v11 = vpop.f32.mrb[13].mxu0 }
 0x1b3   :  { %v729_v12 = vadd.f32 %v1556_v14, %v728_v11  ;;  %v1109_v48 = vpop.f32.mrb[14].mxu0 }
 0x1b4   :  { %v821_v13 = vmul.f32 0.2, %v737_v3  ;;  %v740_v50 = vadd.f32 %v1109_v48, %v1556_v14  ;;  %v731_v55 = vpop.f32.mrb[15].mxu0 }
 0x1b5   :  { %v819_v15 = vmul.f32 0.2, %v729_v12  ;;  %v732_v53 = vadd.f32 %v1556_v14, %v731_v55 }
 0x1b6   :  { %v822_v16 = vmul.f32 0.2, %v740_v50  ;;  %v853_v18 = vmax.f32 %v737_v3, %v821_v13 }
 0x1b7   :  { %v820_v17 = vmul.f32 0.2, %v732_v53  ;;  %v851_v20 = vmax.f32 %v729_v12, %v819_v15 }
 0x1b8   :  { %v854_v19 = vmax.f32 %v740_v50, %v822_v16 }
 0x1b9   :  { %v852_v21 = vmax.f32 %v732_v53, %v820_v17 }
 0x1ba   :  { %v1592_v22 = vpack.c.bf16 %v854_v19, %v853_v18 }
 0x1bb   :  { %v1594_v59 = vpack.c.bf16 %v852_v21, %v851_v20 }
 0x1c7   :  { %v1112_v23 = vpop.f32.mrb[16].mxu0 }
 0x1c8   :  { %v753_v24 = vadd.f32 %v1112_v23, %v1556_v14  ;;  %v744_v25 = vpop.f32.mrb[17].mxu0 }
 0x1c9   :  { %v745_v26 = vadd.f32 %v1556_v14, %v744_v25  ;;  %v1113_v27 = vpop.f32.mrb[18].mxu0 }
 0x1ca   :  { %v825_v28 = vmul.f32 0.2, %v753_v24  ;;  %v756_v29 = vadd.f32 %v1113_v27, %v1556_v14  ;;  %v747_v30 = vpop.f32.mrb[19].mxu0 }
 0x1cb   :  { %v823_v32 = vmul.f32 0.2, %v745_v26  ;;  %v748_v33 = vadd.f32 %v1556_v14, %v747_v30 }
 0x1cc   :  { %v826_v35 = vmul.f32 0.2, %v756_v29  ;;  %v857_v38 = vmax.f32 %v753_v24, %v825_v28 }
 0x1cd   :  { %v824_v36 = vmul.f32 0.2, %v748_v33  ;;  %v855_v40 = vmax.f32 %v745_v26, %v823_v32 }
 0x1ce   :  { %v858_v39 = vmax.f32 %v756_v29, %v826_v35 }
 0x1cf   :  { %v856_v41 = vmax.f32 %v748_v33, %v824_v36 }
 0x1d0   :  { %v1130_v42 = vpack.c.bf16 %v858_v39, %v857_v38  ;;  %v878_v38 = vlaneseq }
 0x1d1   :  { %v1126_v43 = vpack.c.bf16 %v856_v41, %v855_v40 }
 0x1d2   :  { %v879_v39 = vshrl.u32 %v878_v38, 7  ;;  %vm991_vm2 = vcmp.lt.s32.totalorder %v878_v38, 256 }
 0x1d3   :  { %1127 = vmatprep.subr.bf16.mxu1 %v1126_v43 }
 0x1d4   :  { %1129 = vmatpush3.bf16.xpose.msra.mxu1 %v1566_v34  ;;  %v880_v40 = vsub.s32 0, %v879_v39 }
 0x1d5   :  { %1131 = vmatprep.subr.bf16.mxu1 %v1130_v42 }
 0x1dc   :  { %1133 = vmatpush3.bf16.xpose.msra.mxu1 %v1563_v31 }
 0x1dd   :  { %v1116_v44 = vpop.f32.mrb[20].mxu0 }
 0x1de   :  { %v769_v45 = vadd.f32 %v1116_v44, %v1556_v14  ;;  %v760_v46 = vpop.f32.mrb[21].mxu0 }
 0x1df   :  { %v761_v49 = vadd.f32 %v1556_v14, %v760_v46  ;;  %v1117_v51 = vpop.f32.mrb[22].mxu0 }
 0x1e0   :  { %v829_v54 = vmul.f32 0.2, %v769_v45  ;;  %v772_v52 = vadd.f32 %v1117_v51, %v1556_v14  ;;  %v763_v56 = vpop.f32.mrb[23].mxu0 }
 0x1e1   :  { %v827_v57 = vmul.f32 0.2, %v761_v49  ;;  %v764_v37 = vadd.f32 %v1556_v14, %v763_v56 }
 0x1e2   :  { %v830_v58 = vmul.f32 0.2, %v772_v52  ;;  %v861_v34 = vmax.f32 %v769_v45, %v829_v54 }
 0x1e3   :  { %v828_v61 = vmul.f32 0.2, %v764_v37  ;;  %v859_v63 = vmax.f32 %v761_v49, %v827_v57 }
 0x1e4   :  { %v862_v62 = vmax.f32 %v772_v52, %v830_v58 }
 0x1e5   :  { %v860_v31 = vmax.f32 %v764_v37, %v828_v61  ;;  %v1228_v37 = vmov 1966171168  }
 0x1e6   :  { %v1138_v1 = vpack.c.bf16 %v862_v62, %v861_v34  ;;  %v975_v58 = vunpack.c.l.s4 %v1228_v37 }
 0x1e7   :  { %v1134_v2 = vpack.c.bf16 %v860_v31, %v859_v63 }
 0x1e8   :  { %v976_v61 = vunpack.c.0.s8 %v975_v58 }
 0x1e9   :  { %1135 = vmatprep.subr.bf16.mxu1 %v1134_v2 }
 0x1ea   :  { %1137 = vmatpush3.bf16.xpose.msra.mxu1 %v1572_v7 }
 0x1eb   :  { %1139 = vmatprep.subr.bf16.mxu1 %v1138_v1 }
 0x1f2   :  { %1141 = vmatpush3.bf16.xpose.msra.mxu1 %v1570_v47 }
 0x1f3   :  { %v1120_v0 = vpop.f32.mrb[24].mxu0 }
 0x1f4   :  { %v785_v4 = vadd.f32 %v1120_v0, %v1556_v14  ;;  %v776_v5 = vpop.f32.mrb[25].mxu0  ;;  %v979_v0 = vsub.s32 %v976_v61, %v879_v39 }
 0x1f5   :  { %v777_v9 = vadd.f32 %v1556_v14, %v776_v5  ;;  %v1121_v10 = vpop.f32.mrb[26].mxu0 }
 0x1f6   :  { %v833_v3 = vmul.f32 0.2, %v785_v4  ;;  %v788_v11 = vadd.f32 %v1121_v10, %v1556_v14  ;;  %v779_v12 = vpop.f32.mrb[27].mxu0 }
 0x1f7   :  { %v831_v48 = vmul.f32 0.2, %v777_v9  ;;  %v780_v13 = vadd.f32 %v1556_v14, %v779_v12 }
 0x1f8   :  { %v834_v50 = vmul.f32 0.2, %v788_v11  ;;  %v865_v7 = vmax.f32 %v785_v4, %v833_v3 }
 0x1f9   :  { %v832_v55 = vmul.f32 0.2, %v780_v13  ;;  %v863_v53 = vmax.f32 %v777_v9, %v831_v48 }
 0x1fa   :  { %v866_v15 = vmax.f32 %v788_v11, %v834_v50 }
 0x1fb   :  { %v864_v47 = vmax.f32 %v780_v13, %v832_v55 }
 0x1fc   :  { %v1146_v16 = vpack.c.bf16 %v866_v15, %v865_v7 }
 0x1fd   :  { %v1142_v17 = vpack.c.bf16 %v864_v47, %v863_v53 }
 0x1ff   :  { %1143 = vmatprep.subr.bf16.mxu1 %v1142_v17 }
 0x200   :  { %1145 = vmatpush3.bf16.xpose.msra.mxu1 %v1586_v8 }
 0x201   :  { %1147 = vmatprep.subr.bf16.mxu1 %v1146_v16 }
 0x208   :  { %1149 = vmatpush3.bf16.xpose.msra.mxu1 %v1584_v6 }
 0x209   :  { %v1124_v18 = vpop.f32.mrb[28].mxu0 }
 0x20a   :  { %v801_v19 = vadd.f32 %v1124_v18, %v1556_v14  ;;  %v792_v20 = vpop.f32.mrb[29].mxu0 }
 0x20b   :  { %v793_v21 = vadd.f32 %v1556_v14, %v792_v20  ;;  %v1125_v23 = vpop.f32.mrb[30].mxu0 }
 0x20c   :  { %v837_v24 = vmul.f32 0.2, %v801_v19  ;;  %v804_v25 = vadd.f32 %v1125_v23, %v1556_v14  ;;  %v795_v26 = vpop.f32.mrb[31].mxu0 }
 0x20d   :  { %v835_v27 = vmul.f32 0.2, %v793_v21  ;;  %v796_v28 = vadd.f32 %v1556_v14, %v795_v26  ;;  %v876_v14 = vpop.permute.xlu1 %875 }
 0x20e   :  { %v838_v29 = vmul.f32 0.2, %v804_v25  ;;  %v869_v8 = vmax.f32 %v801_v19, %v837_v24  ;;  %v881_v41 = vrot.slane %v876_v14, %v880_v40 }
 0x20f   :  { %v836_v30 = vmul.f32 0.2, %v796_v28  ;;  %v867_v33 = vmax.f32 %v793_v21, %v835_v27 }
 0x210   :  { %v870_v32 = vmax.f32 %v804_v25, %v838_v29 }
 0x211   :  { %v868_v6 = vmax.f32 %v796_v28, %v836_v30 }
 0x212   :  { %v1154_v35 = vpack.c.bf16 %v870_v32, %v869_v8 }
 0x213   :  { %v1150_v36 = vpack.c.bf16 %v868_v6, %v867_v33 }
 0x215   :  { %1151 = vmatprep.subr.bf16.mxu1 %v1150_v36 }
 0x216   :  { %1153 = vmatpush3.bf16.xpose.msra.mxu1 %v1594_v59 }
 0x217   :  { %1155 = vmatprep.subr.bf16.mxu1 %v1154_v35 }
 0x21e   :  { %1157 = vmatpush3.bf16.xpose.msra.mxu1 %v1592_v22 }
 0x225   :  { %1077 = vmatmul.mubr.f32.vlgmr.msra.gmra.mrb[0].mxu1 %v1580_v60 }
 0x2f8   :  { %v948_v42 = vpop.f32.mrb[0].mxu1 }
 0x2f9   :  { %v949_v43 = vadd.f32 %v948_v42, %v881_v41  ;;  %v950_v44 = vpop.f32.mrb[1].mxu1 }
 0x2fa   :  { %v951_v45 = vadd.f32 %v950_v44, %v881_v41 }
 0x2fb   :  { %v953_v46 = vand.u32 2147483647, %v949_v43  ;;  %vm961_vm0 = vcmp.ge.f32.partialorder %v949_v43, 0.0 }
 0x2fc   :  { %v954_v49 = vand.u32 2147483647, %v951_v45  ;;  %vm962_vm1 = vcmp.ge.f32.partialorder %v951_v45, 0.0 }
 0x2fd   :  { %v955_v51 = vsub.f32 0.0, %v953_v46 }
 0x2fe   :  { %v956_v54 = vsub.f32 0.0, %v954_v49 }
 0x2ff   :  { %v957_v52 = vmul.f32 1.442695, %v955_v51 }
 0x300   :  { %v959_v59 = vmul.f32 1.442695, %v956_v54 }
 0x301   :  { %1194 = vpow2.f32 %v957_v52 }
 0x302   :  { %1196 = vpow2.f32 %v959_v59 }
 0x30b   :  { %v1195_v22 = vpop.eup %1194 }
 0x30c   :  { %v1197_v56 = vpop.eup %1196  ;;  %v965_v60 = vadd.f32 1.0, %v1195_v22  ;;  %v963_v62 = vsel %vm961_vm0, 1.0, %v1195_v22 }
 0x30d   :  { %v966_v57 = vadd.f32 1.0, %v1197_v56  ;;  %v964_v1 = vsel %vm962_vm1, 1.0, %v1197_v56 }
 0x30e   :  { %1198 = vrcp.f32 %v965_v60 }
 0x30f   :  { %1200 = vrcp.f32 %v966_v57 }
 0x318   :  { %v1199_v34 = vpop.eup %1198 }
 0x319   :  { %v1201_v63 = vpop.eup %1200  ;;  %v969_v31 = vmul.f32 %v1199_v34, %v963_v62 }
 0x31a   :  { %v970_v2 = vmul.f32 %v1201_v63, %v964_v1 }
 0x31c   :  { %v973_v4 = vcombine.low %v969_v31, %v970_v2 }
 0x31e   :  { %v980_v5 = vrot.slane %v973_v4, %v979_v0 }
 0x320   :  { %v987_v9 = vrot.slane %v980_v5, %v979_v0 }
 0x322   :  { %993 = vst.msk [vmem:[#allocation3] sm:$0x3] %vm991_vm2, %v987_v9 }
 0x323   :  { %1213 = shalt.err (!%p1210_p4)
}
 0x324   :  { %s1214_s18 = scalar_lea.hbm %s1640_s7, 32 }
 0x325   :  { %p1215_p5 = scmp.ne.s32.totalorder %s1640_s7, %s1214_s18  ;;  %p1218_p6 = scmp.lt.u32.totalorder %s1214_s18, %s1640_s7 }
 0x327   :  { %p1220_p7 = pnand %p1218_p6, %p1215_p5 }
 0x329   :  { %1223 = shalt.err (!%p1220_p7)
}
 0x32a   :  { %1003 = dma.vmem_to_hbm [thread:$0]  %s1001_s14, 32, %s1640_s7, [#allocation4]  }
 0x32b   :  { %1224 = dma.done.wait [#allocation4], 32  }
 0x32c   :  { %1225 = vsyncadd [#allocation4], 4294967264 }
 0x32d   :  { %1007 = vsyncpa [#allocation4], 1 }

</bundles_post_ra>
